<compile_context>
chip_gen: v5e
topology: v5e:2x2
jax: 0.10.0
libtpu: 0.0.40
codegen_flags: <defaults>
</compile_context>

<pallas_src>
import functools

import jax
import jax.numpy as jnp
from jax.experimental import pallas as pl
from jax.experimental.pallas import tpu as pltpu

LANE = 128       # lane width: hidden dim padded to a multiple of this
SUBLANE = 16     # batch rounded to this (bf16/f32 sublane-friendly)
TB_MAX = 256     # max batch-tile rows per grid step (review: 256-512 sweet spot)


def _round_up(n, m):
    return ((n + m - 1) // m) * m


def mlp_kernel(x_ref, w1_ref, b1_ref, w2_ref, b2_ref, o_ref):
    # x arrives f32 (unpadded lanes); cast to bf16 for the MXU in-kernel.
    x = x_ref[...].astype(jnp.bfloat16)
    # fc1: (tb, in) @ (in, hid_p) -> f32 accumulate on the MXU
    h = jnp.dot(x, w1_ref[...], preferred_element_type=jnp.float32)
    # bias + ReLU fused (VPU, hidden under MXU slack)
    h = jnp.maximum(h + b1_ref[...], 0.0)
    # fc2: cast activations to bf16 for the MXU, f32 accumulate
    out = jnp.dot(h.astype(w2_ref.dtype), w2_ref[...],
                  preferred_element_type=jnp.float32)
    o_ref[...] = (out + b2_ref[...]).astype(o_ref.dtype)


@jax.jit
def simple_nn_forward(x, w1_p, b1_p, w2_p, b2_p):
    """relu(x @ W1 + b1) @ W2 + b2 with pre-padded / pre-cast params.

    w1_p: (in, hid_p) bf16, b1_p: (1, hid_p) f32,
    w2_p: (hid_p, out) bf16, b2_p: (1, out) f32 (see prepare_params).
    Returns (B, out) float32.
    """
    B, in_size = x.shape
    hid_p = w1_p.shape[1]
    out_size = w2_p.shape[1]

    # --- adaptive batch tile -------------------------------------------------
    B16 = _round_up(B, SUBLANE)
    tb = B16 if B16 <= TB_MAX else TB_MAX
    B_p = _round_up(B16, tb)
    num_b_tiles = B_p // tb

    # Only batch padding of x (no lane padding).
    x_p = jnp.pad(x, ((0, B_p - B), (0, 0))) if B_p != B else x

    # --- cost estimate -------------------------------------------------------
    flops = 2 * B_p * (in_size * hid_p + hid_p * out_size)
    bytes_accessed = (x_p.size * 4 + w1_p.size * 2 + w2_p.size * 2 +
                      b1_p.size * 4 + b2_p.size * 4 + B_p * out_size * 4)
    cost = pl.CostEstimate(flops=flops, transcendentals=0,
                           bytes_accessed=bytes_accessed)

    out_padded = pl.pallas_call(
        mlp_kernel,
        out_shape=jax.ShapeDtypeStruct((B_p, out_size), jnp.float32),
        grid=(num_b_tiles,),
        in_specs=[
            # x: one batch tile per grid step; last dim = full array dim (legal).
            pl.BlockSpec((tb, in_size), lambda i: (i, 0)),
            # weights / biases: constant block -> VMEM-resident across tiles.
            pl.BlockSpec((in_size, hid_p), lambda i: (0, 0)),
            pl.BlockSpec((1, hid_p), lambda i: (0, 0)),
            pl.BlockSpec((hid_p, out_size), lambda i: (0, 0)),
            pl.BlockSpec((1, out_size), lambda i: (0, 0)),
        ],
        # Output un-padded in lanes (out_size); only batch is tiled.
        out_specs=pl.BlockSpec((tb, out_size), lambda i: (i, 0)),
        compiler_params=pltpu.CompilerParams(
            dimension_semantics=("parallel",)),
        cost_estimate=cost,
    )(x_p, w1_p, b1_p, w2_p, b2_p)

    # Drop only the batch-pad rows (no lane slice needed).
    return out_padded[:B] if B_p != B else out_padded


def prepare_params(w1, b1, w2, b2):
    """One-time (outside jit) padding + cast of the parameters.

    Pads the hidden dim to a multiple of 128 lanes with zeros (ReLU(0)=0 and
    the padded w2 rows are zero, so results are unchanged) and casts the
    weights to bf16; biases stay f32.
    """
    in_size, hidden = w1.shape
    out_size = w2.shape[1]
    hid_p = _round_up(hidden, LANE)

    w1_p = jnp.pad(w1, ((0, 0), (0, hid_p - hidden))).astype(jnp.bfloat16)
    b1_p = jnp.pad(b1, ((0, 0), (0, hid_p - hidden))).astype(jnp.float32)
    w2_p = jnp.pad(w2, ((0, hid_p - hidden), (0, 0))).astype(jnp.bfloat16)
    b2_p = b2.astype(jnp.float32)
    return w1_p, b1_p, w2_p, b2_p


def init_params(key, input_size, hidden_size, output_size, dtype=jnp.float32):
    """Deterministic init mimicking nn.Linear's U(-1/sqrt(fan_in), 1/sqrt(fan_in))."""
    k1, k2, k3, k4 = jax.random.split(key, 4)
    bound1 = 1.0 / (input_size ** 0.5)
    bound2 = 1.0 / (hidden_size ** 0.5)
    # Stored as (in, out) = PyTorch weight.T
    w1 = jax.random.uniform(k1, (input_size, hidden_size), dtype, -bound1, bound1)
    b1 = jax.random.uniform(k2, (1, hidden_size), dtype, -bound1, bound1)
    w2 = jax.random.uniform(k3, (hidden_size, output_size), dtype, -bound2, bound2)
    b2 = jax.random.uniform(k4, (1, output_size), dtype, -bound2, bound2)
    return w1, b1, w2, b2


if __name__ == "__main__":
    # Small logical shapes consistent with the module:
    # Linear(input->hidden), ReLU, Linear(hidden->output).
    batch, input_size, hidden_size, output_size = 8, 32, 64, 16

    key = jax.random.PRNGKey(0)
    kx, kp = jax.random.split(key)
    x = jax.random.normal(kx, (batch, input_size), jnp.float32)
    w1, b1, w2, b2 = init_params(kp, input_size, hidden_size, output_size)

    # One-time parameter preparation (hoisted out of the per-call path).
    params = prepare_params(w1, b1, w2, b2)

    out = simple_nn_forward(x, *params)
    jax.block_until_ready(out)

    # Reference check in plain JAX (same math as the PyTorch forward).
    # Tolerance loosened for bf16 operands (f32 accumulation).
    ref = jnp.maximum(x @ w1 + b1, 0.0) @ w2 + b2
    assert out.shape == (batch, output_size)
    assert jnp.allclose(out, ref, atol=2e-2, rtol=2e-2), (
        jnp.max(jnp.abs(out - ref)))

    print("KERNEL_OK")
</pallas_src>

<mosaic_0001>
module attributes {stable_mosaic.version = 11 : i64} {
  func.func @mlp_kernel(%arg0: i32, %arg1: memref<16x32xf32, #tpu.memory_space<vmem>>, %arg2: memref<32x128xbf16, #tpu.memory_space<vmem>>, %arg3: memref<1x128xf32, #tpu.memory_space<vmem>>, %arg4: memref<128x16xbf16, #tpu.memory_space<vmem>>, %arg5: memref<1x16xf32, #tpu.memory_space<vmem>>, %arg6: memref<16x16xf32, #tpu.memory_space<vmem>>) attributes {dimension_semantics = [#tpu.dimension_semantics<parallel>], iteration_bounds = array<i64: 1>, scalar_prefetch = 0 : i64, scratch_operands = 0 : i64, tpu.core_type = #tpu.core_type<tc>, window_params = [{transform_indices = @transform_0, window_bounds = array<i64: 16, 32>}, {pipeline_mode = #tpu.pipeline_mode<synchronous>, transform_indices = @transform_1, window_bounds = array<i64: 32, 128>}, {pipeline_mode = #tpu.pipeline_mode<synchronous>, transform_indices = @transform_2, window_bounds = array<i64: 1, 128>}, {pipeline_mode = #tpu.pipeline_mode<synchronous>, transform_indices = @transform_3, window_bounds = array<i64: 128, 16>}, {pipeline_mode = #tpu.pipeline_mode<synchronous>, transform_indices = @transform_4, window_bounds = array<i64: 1, 16>}, {transform_indices = @transform_5, window_bounds = array<i64: 16, 16>}]} {
    %c0 = arith.constant 0 : index
    %c0_0 = arith.constant 0 : index
    %0 = vector.load %arg1[%c0, %c0_0] : memref<16x32xf32, #tpu.memory_space<vmem>>, vector<16x32xf32>
    %1 = arith.truncf %0 : vector<16x32xf32> to vector<16x32xbf16>
    %c0_1 = arith.constant 0 : index
    %c0_2 = arith.constant 0 : index
    %2 = vector.load %arg2[%c0_1, %c0_2] : memref<32x128xbf16, #tpu.memory_space<vmem>>, vector<32x128xbf16>
    %cst = arith.constant dense<0.000000e+00> : vector<16x128xf32>
    %3 = tpu.matmul %1, %2, %cst {dimension_numbers = #tpu.dot_dimension_numbers<[1], [0], [0], [1], [0, 0, 1, 1], [], []>} : vector<16x32xbf16>, vector<32x128xbf16>, vector<16x128xf32> -> vector<16x128xf32>
    %c0_3 = arith.constant 0 : index
    %c0_4 = arith.constant 0 : index
    %4 = vector.load %arg3[%c0_3, %c0_4] : memref<1x128xf32, #tpu.memory_space<vmem>>, vector<1x128xf32>
    %5 = vector.broadcast %4 : vector<1x128xf32> to vector<16x128xf32>
    %6 = arith.addf %3, %5 : vector<16x128xf32>
    %cst_5 = arith.constant 0.000000e+00 : f32
    %7 = vector.broadcast %cst_5 : f32 to vector<16x128xf32>
    %8 = arith.maximumf %6, %7 : vector<16x128xf32>
    %9 = arith.truncf %8 : vector<16x128xf32> to vector<16x128xbf16>
    %c0_6 = arith.constant 0 : index
    %c0_7 = arith.constant 0 : index
    %10 = vector.load %arg4[%c0_6, %c0_7] : memref<128x16xbf16, #tpu.memory_space<vmem>>, vector<128x16xbf16>
    %cst_8 = arith.constant dense<0.000000e+00> : vector<16x16xf32>
    %11 = tpu.matmul %9, %10, %cst_8 {dimension_numbers = #tpu.dot_dimension_numbers<[1], [0], [0], [1], [0, 0, 1, 1], [], []>} : vector<16x128xbf16>, vector<128x16xbf16>, vector<16x16xf32> -> vector<16x16xf32>
    %c0_9 = arith.constant 0 : index
    %c0_10 = arith.constant 0 : index
    %12 = vector.load %arg5[%c0_9, %c0_10] : memref<1x16xf32, #tpu.memory_space<vmem>>, vector<1x16xf32>
    %13 = vector.broadcast %12 : vector<1x16xf32> to vector<16x16xf32>
    %14 = arith.addf %11, %13 : vector<16x16xf32>
    %c0_11 = arith.constant 0 : index
    %c0_12 = arith.constant 0 : index
    %15 = vector.load %arg6[%c0_11, %c0_12] : memref<16x16xf32, #tpu.memory_space<vmem>>, vector<16x16xf32>
    tpu.vector_store %arg6[%c0_11, %c0_12], %14 {strides = array<i32>} : memref<16x16xf32, #tpu.memory_space<vmem>>, vector<16x16xf32>,
    return
  }
  func.func @transform_0(%arg0: i32) -> (i32, i32) {
    %c0_i32 = arith.constant 0 : i32
    %c0_i32_0 = arith.constant 0 : i32
    return %arg0, %c0_i32 : i32, i32
  }
  func.func @transform_1(%arg0: i32) -> (i32, i32) {
    %c0_i32 = arith.constant 0 : i32
    %c0_i32_0 = arith.constant 0 : i32
    %c0_i32_1 = arith.constant 0 : i32
    return %c0_i32, %c0_i32_0 : i32, i32
  }
  func.func @transform_2(%arg0: i32) -> (i32, i32) {
    %c0_i32 = arith.constant 0 : i32
    %c0_i32_0 = arith.constant 0 : i32
    %c0_i32_1 = arith.constant 0 : i32
    return %c0_i32, %c0_i32_0 : i32, i32
  }
  func.func @transform_3(%arg0: i32) -> (i32, i32) {
    %c0_i32 = arith.constant 0 : i32
    %c0_i32_0 = arith.constant 0 : i32
    %c0_i32_1 = arith.constant 0 : i32
    return %c0_i32, %c0_i32_0 : i32, i32
  }
  func.func @transform_4(%arg0: i32) -> (i32, i32) {
    %c0_i32 = arith.constant 0 : i32
    %c0_i32_0 = arith.constant 0 : i32
    %c0_i32_1 = arith.constant 0 : i32
    return %c0_i32, %c0_i32_0 : i32, i32
  }
  func.func @transform_5(%arg0: i32) -> (i32, i32) {
    %c0_i32 = arith.constant 0 : i32
    %c0_i32_0 = arith.constant 0 : i32
    return %arg0, %c0_i32 : i32, i32
  }
}

</mosaic_0001>

<bundles_post_ra>
// kernel: simple_nn_forward.1
= control target key start
LH: loop header
LB: loop body
LE: loop exit
PB: predicated region body
PF: predicated region fallthrough
CT: control target
= control target key end

     0   :  { %vm44_vm0 = vcmask 261120   ;;  %vm147_vm1 = vcmask 130048   ;;  %s285_s1 = inlined_call_operand.vmem [shape: bf16[32,128], index: 1, kind: input, shape index: {}]   ;;  %s286_s0 = inlined_call_operand.vmem [shape: f32[16,32], index: 0, kind: input, shape index: {}]   ;;  %s287_s3 = inlined_call_operand.vmem [shape: bf16[128,16], index: 3, kind: input, shape index: {}]   ;;  %s288_s2 = inlined_call_operand.vmem [shape: f32[1,128], index: 2, kind: input, shape index: {}]   ;;  %s289_s4 = inlined_call_operand.vmem [shape: f32[1,16], index: 4, kind: input, shape index: {}]   ;;  %s290_s5 = inlined_call_operand.vmem [shape: f32[16,16], index: 5, kind: output, shape index: {}]  }
   0x1   :  { %v196_v0 = vld [vmem:[%s285_s1 + $0x8] sm:$0xff]  ;;  %v195_v1 = vld [vmem:[%s285_s1] sm:$0xff]  ;;  %v204_v2 = vld [vmem:[%s287_s3 + $0x38] sm:$0xff] }
   0x2   :  { %54 = vmatpush.bf16.msra.mxu0 %v196_v0  ;;  %v21_v3 = vld [vmem:[%s286_s0] sm:$0xff]  ;;  %v22_v4 = vld [vmem:[%s286_s0 + $0x8] sm:$0xff]  ;;  %133 = vmatpush.bf16.msra.mxu1 %v204_v2  ;;  %v203_v5 = vld [vmem:[%s287_s3 + $0x30] sm:$0xff] }
   0x3   :  { %v23_v6 = vpack.c.bf16 %v22_v4, %v21_v3  ;;  %v202_v7 = vld [vmem:[%s287_s3 + $0x28] sm:$0xff]  ;;  %v201_v8 = vld [vmem:[%s287_s3 + $0x20] sm:$0xff]  ;;  %v200_v9 = vld [vmem:[%s287_s3 + $0x18] sm:$0xff] }
   0x4   :  { %v199_v10 = vld [vmem:[%s287_s3 + $0x10] sm:$0xff]  ;;  %v198_v11 = vld [vmem:[%s287_s3 + $0x8] sm:$0xff]  ;;  %v197_v12 = vld [vmem:[%s287_s3] sm:$0xff] }
   0x5   :  { %v205_v14 = vld [vmem:[%s288_s2] ss:$0 sm:$0xff] }
   0x6   :  { %55 = vmatpush.bf16.msra.mxu0 %v195_v1  ;;  %134 = vmatpush.bf16.msra.mxu1 %v203_v5  ;;  %v206_v21 = vld [vmem:[%s289_s4] ss:$0 sm:$0xff] }
   0x9   :  { %162 = vmatmul.msk.bf16.vlgmr.msra.gmra.mxu0 %vm44_vm0, %v23_v6 }
   0xa   :  { %135 = vmatpush.bf16.msra.mxu1 %v202_v7 }
   0xe   :  { %136 = vmatpush.bf16.msra.mxu1 %v201_v8 }
  0x12   :  { %137 = vmatpush.bf16.msra.mxu1 %v200_v9 }
  0x16   :  { %138 = vmatpush.bf16.msra.mxu1 %v199_v10 }
  0x1a   :  { %139 = vmatpush.bf16.msra.mxu1 %v198_v11 }
  0x1e   :  { %140 = vmatpush.bf16.msra.mxu1 %v197_v12 }
  0x86   :  { %v57_v13 = vpop.f32.mrf.mxu0 }
  0x87   :  { %v58_v15 = vadd.f32 %v205_v14, %v57_v13 }
  0x89   :  { %v62_v18 = vmax.f32 %v58_v15, 0.0 }
  0x8e   :  { %v59_v16 = vpop.f32.mrf.mxu0 }
  0x8f   :  { %v60_v17 = vadd.f32 %v205_v14, %v59_v16 }
  0x91   :  { %v63_v19 = vmax.f32 %v60_v17, 0.0 }
  0x93   :  { %v64_v20 = vpack.c.bf16 %v63_v19, %v62_v18 }
  0x95   :  { %141 = vmatmul.bf16.vlgmr.msra.gmra.mxu1 %v64_v20 }
 0x112   :  { %v142_v22 = vpop.f32.mrf.mxu1 }
 0x113   :  { %v143_v23 = vadd.f32 %v206_v21, %v142_v22 }
 0x115   :  { %148 = vst.msk [vmem:[%s290_s5] sm:$0xff] %vm147_vm1, %v143_v23 }
 0x11a   :  { %v144_v24 = vpop.f32.mrf.mxu1 }
 0x11b   :  { %v145_v25 = vadd.f32 %v206_v21, %v144_v24 }
 0x11d   :  { %149 = vst.msk [vmem:[%s290_s5 + $0x8] sm:$0xff] %vm147_vm1, %v145_v25 }

</bundles_post_ra>
